<compile_context>
chip_gen: v7x
topology: tpu7x:2x2x1
jax: 0.10.0
libtpu: 0.0.40
codegen_flags: <defaults>
</compile_context>

<pallas_src>
import functools

import jax
import jax.numpy as jnp
from jax.experimental import pallas as pl
from jax.experimental.pallas import tpu as pltpu


# ------------------------------ Pallas kernel --------------------------------
def probability_nn_kernel(d_ctx, ctx_ref, summ_ref, w_ref, b_ref, o_ref):
    # ctx_ref:  (N, d_ctx)   summ_ref: (N, d_state)   [VMEM]
    # w_ref:    (1, d_ctx + d_state)                  [VMEM]
    # b_ref:    (1, 1)                                [SMEM]
    # o_ref:    (N, 1)                                [VMEM]
    w_row = w_ref[...]                    # one load of the full weight row
    wc = w_row[:, :d_ctx]                 # static slices: no data movement cost
    ws = w_row[:, d_ctx:]

    # VPU multiply + XLU lane reduce (no MXU detour for a width-1 output).
    logits = (
        jnp.sum(ctx_ref[...] * wc, axis=-1, keepdims=True)
        + jnp.sum(summ_ref[...] * ws, axis=-1, keepdims=True)
        + b_ref[0, 0]                     # scalar bias from SMEM
    )

    # Two-sided numerically stable sigmoid; exp goes to the EUP slot.
    e = jnp.exp(-jnp.abs(logits))
    o_ref[...] = jnp.where(logits >= 0.0, 1.0 / (1.0 + e), e / (1.0 + e))


# ------------------------------ kernel wrapper --------------------------------
def probability_nn(context_vector, summary_current_state, w, b):
    """Equivalent of ProbabilityNN.forward.

    context_vector:        (..., d_ctx)
    summary_current_state: (..., d_state)
    w: (d_ctx + d_state, 1)   (i.e. linear1.weight.T)
    b: (1, 1)                 (i.e. linear1.bias)
    returns: (..., 1)
    """
    d_ctx = context_vector.shape[-1]
    d_state = summary_current_state.shape[-1]
    num_features = d_ctx + d_state
    assert w.shape == (num_features, 1)

    lead = context_vector.shape[:-1]
    assert summary_current_state.shape[:-1] == lead
    n_rows = 1
    for s in lead:
        n_rows *= s

    # Flatten leading dims so all rows go through one kernel invocation.
    ctx2 = context_vector.reshape(n_rows, d_ctx).astype(jnp.float32)
    summ2 = summary_current_state.reshape(n_rows, d_state).astype(jnp.float32)
    w_row = w.reshape(1, num_features).astype(jnp.float32)   # single weight row
    b_smem = b.reshape(1, 1).astype(jnp.float32)

    vmem = pl.BlockSpec(memory_space=pltpu.MemorySpace.VMEM)
    smem = pl.BlockSpec(memory_space=pltpu.MemorySpace.SMEM)

    cost = pl.CostEstimate(
        flops=2 * n_rows * num_features,
        transcendentals=n_rows,
        bytes_accessed=4 * (n_rows * num_features + num_features + n_rows + 1),
    )

    out = pl.pallas_call(
        functools.partial(probability_nn_kernel, d_ctx),
        out_shape=jax.ShapeDtypeStruct((n_rows, 1), jnp.float32),
        in_specs=[vmem, vmem, vmem, smem],
        out_specs=vmem,
        cost_estimate=cost,
    )(ctx2, summ2, w_row, b_smem)

    return out.reshape(*lead, 1)


# --------------------------- parameter construction ---------------------------
def init_params(key, num_features):
    # TODO(synk): init_linear_weights() from the original repo is not shown;
    # using a plain scaled-normal init with the same parameter shapes.
    k1, k2 = jax.random.split(key)
    w = jax.random.normal(k1, (num_features, 1), jnp.float32) / jnp.sqrt(
        jnp.float32(num_features)
    )
    b = 0.01 * jax.random.normal(k2, (1, 1), jnp.float32)
    return w, b


# ----------------------------------- main --------------------------------------
if __name__ == "__main__":
    B, S = 2, 8
    d_ctx, d_state = 16, 16
    num_features = d_ctx + d_state  # 32

    key = jax.random.PRNGKey(0)
    kc, ks, kp = jax.random.split(key, 3)
    context_vector = jax.random.normal(kc, (B, S, d_ctx), jnp.float32)
    summary_current_state = jax.random.normal(ks, (B, S, d_state), jnp.float32)
    w, b = init_params(kp, num_features)

    out = probability_nn(context_vector, summary_current_state, w, b)
    out = jax.block_until_ready(out)

    assert out.shape == (B, S, 1)
    assert bool(jnp.all(jnp.isfinite(out)))
    assert bool(jnp.all((out > 0.0) & (out < 1.0)))

    # Pure-JAX reference (concat + linear + sigmoid), same fp32 math.
    inputs = jnp.concatenate([context_vector, summary_current_state], axis=-1)
    ref = jax.nn.sigmoid(jnp.einsum("bsf,fo->bso", inputs, w) + b.reshape(1, 1, 1))
    assert bool(jnp.allclose(out, ref, atol=1e-5, rtol=1e-5))

    print("KERNEL_OK")
</pallas_src>

<mosaic_0001>
module attributes {stable_mosaic.version = 11 : i64} {
  func.func @probability_nn_kernel(%arg0: memref<16x16xf32, #tpu.memory_space<vmem>>, %arg1: memref<16x16xf32, #tpu.memory_space<vmem>>, %arg2: memref<1x32xf32, #tpu.memory_space<vmem>>, %arg3: memref<1x1xf32, #tpu.memory_space<smem>>, %arg4: memref<16x1xf32, #tpu.memory_space<vmem>>) attributes {dimension_semantics = [], scalar_prefetch = 0 : i64, scratch_operands = 0 : i64, tpu.core_type = #tpu.core_type<tc>} {
    %c0 = arith.constant 0 : index
    %c0_0 = arith.constant 0 : index
    %0 = vector.load %arg2[%c0, %c0_0] : memref<1x32xf32, #tpu.memory_space<vmem>>, vector<1x32xf32>
    %1 = vector.extract_strided_slice %0 {offsets = [0, 0], sizes = [1, 16], strides = [1, 1]} : vector<1x32xf32> to vector<1x16xf32>
    %2 = vector.extract_strided_slice %0 {offsets = [0, 16], sizes = [1, 16], strides = [1, 1]} : vector<1x32xf32> to vector<1x16xf32>
    %c0_1 = arith.constant 0 : index
    %c0_2 = arith.constant 0 : index
    %3 = vector.load %arg0[%c0_1, %c0_2] : memref<16x16xf32, #tpu.memory_space<vmem>>, vector<16x16xf32>
    %4 = vector.broadcast %1 : vector<1x16xf32> to vector<16x16xf32>
    %5 = arith.mulf %3, %4 : vector<16x16xf32>
    %cst = arith.constant dense<0.000000e+00> : vector<16xf32>
    %6 = vector.multi_reduction <add>, %5, %cst [1] : vector<16x16xf32> to vector<16xf32>
    %7 = vector.shape_cast %6 : vector<16xf32> to vector<16x1xf32>
    %c0_3 = arith.constant 0 : index
    %c0_4 = arith.constant 0 : index
    %8 = vector.load %arg1[%c0_3, %c0_4] : memref<16x16xf32, #tpu.memory_space<vmem>>, vector<16x16xf32>
    %9 = vector.broadcast %2 : vector<1x16xf32> to vector<16x16xf32>
    %10 = arith.mulf %8, %9 : vector<16x16xf32>
    %cst_5 = arith.constant dense<0.000000e+00> : vector<16xf32>
    %11 = vector.multi_reduction <add>, %10, %cst_5 [1] : vector<16x16xf32> to vector<16xf32>
    %12 = vector.shape_cast %11 : vector<16xf32> to vector<16x1xf32>
    %13 = arith.addf %7, %12 : vector<16x1xf32>
    %c0_6 = arith.constant 0 : index
    %c0_7 = arith.constant 0 : index
    %14 = memref.load %arg3[%c0_6, %c0_7] : memref<1x1xf32, #tpu.memory_space<smem>>
    %15 = vector.broadcast %14 : f32 to vector<16x1xf32>
    %16 = arith.addf %13, %15 : vector<16x1xf32>
    %17 = math.absf %16 : vector<16x1xf32>
    %cst_8 = arith.constant 0.000000e+00 : f32
    %18 = vector.broadcast %cst_8 : f32 to vector<16x1xf32>
    %19 = arith.subf %18, %17 : vector<16x1xf32>
    %20 = math.exp %19 : vector<16x1xf32>
    %cst_9 = arith.constant 0.000000e+00 : f32
    %21 = vector.broadcast %cst_9 : f32 to vector<16x1xf32>
    %22 = arith.cmpf oge, %16, %21 : vector<16x1xf32>
    %cst_10 = arith.constant 1.000000e+00 : f32
    %23 = vector.broadcast %cst_10 : f32 to vector<16x1xf32>
    %24 = arith.addf %23, %20 : vector<16x1xf32>
    %cst_11 = arith.constant 1.000000e+00 : f32
    %25 = vector.broadcast %cst_11 : f32 to vector<16x1xf32>
    %26 = arith.divf %25, %24 : vector<16x1xf32>
    %cst_12 = arith.constant 1.000000e+00 : f32
    %27 = vector.broadcast %cst_12 : f32 to vector<16x1xf32>
    %28 = arith.addf %27, %20 : vector<16x1xf32>
    %29 = arith.divf %20, %28 : vector<16x1xf32>
    %30 = arith.select %22, %26, %29 : vector<16x1xi1>, vector<16x1xf32>
    %c0_13 = arith.constant 0 : index
    %c0_14 = arith.constant 0 : index
    %31 = vector.load %arg4[%c0_13, %c0_14] : memref<16x1xf32, #tpu.memory_space<vmem>>, vector<16x1xf32>
    tpu.vector_store %arg4[%c0_13, %c0_14], %30 {strides = array<i32>} : memref<16x1xf32, #tpu.memory_space<vmem>>, vector<16x1xf32>,
    return
  }
}

</mosaic_0001>

<bundles_post_ra>
// kernel: tpu_custom_call.1
= control target key start
LH: loop header
LB: loop body
LE: loop exit
PB: predicated region body
PF: predicated region fallthrough
CT: control target
= control target key end

     0   :  { %10 = vsyncpa [#allocation4], 0  ;;  %s240_s0 = inlined_call_operand.hbm [shape: f32[16,16], index: 0, kind: input, shape index: {}]   ;;  %s241_s1 = inlined_call_operand.hbm [shape: f32[16,16], index: 1, kind: input, shape index: {}]   ;;  %s242_s2 = inlined_call_operand.vmem [shape: f32[1,32], index: 2, kind: input, shape index: {}]   ;;  %s243_s3 = inlined_call_operand.<no memory space> [shape: f32[1,1], index: 3, kind: input, shape index: {}]   ;;  %s244_s4 = inlined_call_operand.vmem [shape: f32[16,1], index: 4, kind: output, shape index: {}]  }
   0x1   :  { %11 = vsyncpa [#allocation6], 0  ;;  %s174_s15 = smov [#allocation3]   ;;  %s126_s19 = scalar_lea.hbm %s240_s0, 256 }
   0x2   :  { %s17_s16 = sshll.u32 %s174_s15, 4  ;;  %p127_p0 = scmp.ne.s32.totalorder %s240_s0, %s126_s19  ;;  %s18_s16 = int_to_ptr.vmem [resolvable:$true] %s17_s16 }
   0x3   :  { %p130_p1 = scmp.lt.u32.totalorder %s126_s19, %s240_s0 }
   0x5   :  { %p132_p2 = pnand %p130_p1, %p127_p0 }
   0x7   :  { %135 = shalt.err (!%p132_p2)
}
   0x8   :  { %s136_s24 = scalar_lea.vmem %s18_s16, 256  ;;  %p141_p4 = scmp.lt.s32.totalorder %s18_s16, %s18_s16 }
   0x9   :  { %p137_p3 = scmp.ne.s32.totalorder %s18_s16, %s136_s24  ;;  %p142_p5 = scmp.lt.s32.totalorder %s136_s24, %s136_s24 }
   0xb   :  { %p143_p6 = por %p142_p5, %p141_p4 }
   0xd   :  { %p144_p7 = pnand %p143_p6, %p137_p3 }
   0xf   :  { %147 = shalt.err (!%p144_p7)
}
  0x10   :  { %s175_s25 = smov 128   ;;  %s176_s26 = smov 8  }
  0x11   :  { %23 = dma.hbm_to_vmem [thread:$0]  %s240_s0, 256, %s18_s16, [#allocation4], %s175_s25, %s175_s25, %s176_s26  }
  0x12   :  { %s177_s29 = smov [#allocation5]   ;;  %s148_s7 = scalar_lea.hbm %s241_s1, 256 }
  0x13   :  { %s29_s30 = sshll.u32 %s177_s29, 4  ;;  %p149_p8 = scmp.ne.s32.totalorder %s241_s1, %s148_s7  ;;  %s30_s30 = int_to_ptr.vmem [resolvable:$true] %s29_s30 }
  0x14   :  { %p152_p9 = scmp.lt.u32.totalorder %s148_s7, %s241_s1 }
  0x16   :  { %p154_p10 = pnand %p152_p9, %p149_p8 }
  0x18   :  { %157 = shalt.err (!%p154_p10)
}
  0x19   :  { %s158_s12 = scalar_lea.vmem %s30_s30, 256  ;;  %p163_p12 = scmp.lt.s32.totalorder %s30_s30, %s30_s30 }
  0x1a   :  { %p159_p11 = scmp.ne.s32.totalorder %s30_s30, %s158_s12  ;;  %p164_p13 = scmp.lt.s32.totalorder %s158_s12, %s158_s12 }
  0x1c   :  { %p165_p0 = por %p164_p13, %p163_p12 }
  0x1e   :  { %p166_p1 = pnand %p165_p0, %p159_p11 }
  0x20   :  { %169 = shalt.err (!%p166_p1)
}
  0x21   :  { %35 = dma.hbm_to_vmem [thread:$0]  %s241_s1, 256, %s30_s30, [#allocation6], %s175_s25, %s175_s25, %s176_s26  }
  0x22   :  { %170 = dma.done.wait [#allocation4], 256  }
  0x23   :  { %171 = vsyncadd [#allocation4], 4294967040 }
  0x24   :  { %172 = dma.done.wait [#allocation6], 256  }
  0x25   :  { %173 = vsyncadd [#allocation6], 4294967040  ;;  %v112_v0 = vld [vmem:[%s242_s2] ss:$0 sm:$0xff]  ;;  %s178_s16 = smov 112   ;;  %v48_v1 = vld [vmem:[#allocation3 + $0x8] sm:$0xff]  ;;  %v80_v17 = vstv %s243_s3 }
  0x26   :  { %66 = vrot.lane.b32.xlu0 %v112_v0, %s178_s16  ;;  %vm57_vm0 = vcmask 130048   ;;  %v56_v2 = vmul.f32 %v112_v0, %v48_v1  ;;  %v47_v4 = vld [vmem:[#allocation3] sm:$0xff]  ;;  %v64_v7 = vld [vmem:[#allocation5] sm:$0xff]  ;;  %v65_v8 = vld [vmem:[#allocation5 + $0x8] sm:$0xff]  ;;  %vm103_vm1 = vcmask 7168  }
  0x27   :  { %v55_v5 = vmul.f32 %v112_v0, %v47_v4 }
  0x28   :  { %v61_v3 = vsel %vm57_vm0, %v56_v2, 0.0 }
  0x29   :  { %62 = vadd.xlane.f32.xlu1 %v61_v3  ;;  %v58_v6 = vsel %vm57_vm0, %v55_v5, 0.0 }
  0x45   :  { %59 = vadd.xlane.f32.xlu0 %v58_v6 }
  0x98   :  { %v67_v9 = vpop.permute.xlu0 %66 }
  0x99   :  { %v69_v10 = vmul.f32 %v67_v9, %v64_v7  ;;  %v70_v11 = vmul.f32 %v67_v9, %v65_v8 }
  0x9b   :  { %v71_v12 = vsel %vm57_vm0, %v69_v10, 0.0  ;;  %v74_v13 = vsel %vm57_vm0, %v70_v11, 0.0 }
  0x9c   :  { %72 = vadd.xlane.f32.xlu1 %v71_v12 }
  0xa0   :  { %75 = vadd.xlane.f32.xlu1 %v74_v13 }
  0xb6   :  { %v63_v14 = vpop.xlane.xlu1 %62 }
  0xd2   :  { %v60_v15 = vpop.xlane.xlu0 %59 }
 0x129   :  { %v73_v16 = vpop.xlane.xlu1 %72 }
 0x12a   :  { %v77_v18 = vadd.f32 %v73_v16, %v60_v15 }
 0x12c   :  { %v81_v19 = vadd.f32 %v80_v17, %v77_v18 }
 0x12d   :  { %v76_v20 = vpop.xlane.xlu1 %75 }
 0x12e   :  { %v83_v21 = vand.u32 2147483647, %v81_v19  ;;  %v78_v22 = vadd.f32 %v76_v20, %v63_v14  ;;  %vm91_vm2 = vcmp.ge.f32.partialorder %v81_v19, 0.0 }
 0x130   :  { %v85_v23 = vsub.f32 0.0, %v83_v21  ;;  %v82_v24 = vadd.f32 %v80_v17, %v78_v22 }
 0x132   :  { %v87_v25 = vmul.f32 1.442695, %v85_v23  ;;  %v84_v26 = vand.u32 2147483647, %v82_v24  ;;  %vm92_vm3 = vcmp.ge.f32.partialorder %v82_v24, 0.0 }
 0x134   :  { %118 = vpow2.f32 %v87_v25  ;;  %v86_v27 = vsub.f32 0.0, %v84_v26 }
 0x136   :  { %v89_v28 = vmul.f32 1.442695, %v86_v27 }
 0x138   :  { %120 = vpow2.f32 %v89_v28 }
 0x13e   :  { %v119_v29 = vpop.eup %118 }
 0x13f   :  { %v93_v30 = vadd.f32 1.0, %v119_v29 }
 0x141   :  { %122 = vrcp.f32 %v93_v30 }
 0x142   :  { %v121_v31 = vpop.eup %120 }
 0x143   :  { %v94_v32 = vadd.f32 1.0, %v121_v31 }
 0x145   :  { %124 = vrcp.f32 %v94_v32 }
 0x14b   :  { %v123_v33 = vpop.eup %122 }
 0x14c   :  { %v99_v34 = vmul.f32 %v123_v33, %v119_v29 }
 0x14e   :  { %v101_v35 = vsel %vm91_vm2, %v123_v33, %v99_v34 }
 0x14f   :  { %v125_v36 = vpop.eup %124  ;;  %104 = vst.msk [vmem:[%s244_s4] sm:$0xff] %vm103_vm1, %v101_v35 }
 0x150   :  { %v100_v37 = vmul.f32 %v125_v36, %v121_v31 }
 0x152   :  { %v102_v38 = vsel %vm92_vm3, %v125_v36, %v100_v37 }
 0x153   :  { %105 = vst.msk [vmem:[%s244_s4 + $0x8] sm:$0xff] %vm103_vm1, %v102_v38 }
 0x154   :  { %110 = vsyncpa [#allocation4], 1 }
 0x155   :  { %111 = vsyncpa [#allocation6], 1 }

</bundles_post_ra>
